<compile_context>
chip_gen: v6e
topology: v6e:2x2x1
jax: 0.10.0
libtpu: 0.0.40
codegen_flags: <defaults>
</compile_context>

<pallas_src>
import jax
import jax.numpy as jnp
from jax import lax
from jax.experimental import pallas as pl
from jax.experimental.pallas import tpu as pltpu


_DMA_DEPTH = 8                       # in-flight row DMAs for the HBM-gather path
_MAX_PREFETCH_TOKENS = 32768         # cap on scalar-prefetched ids per call (SMEM)
_OUT_TILE_BYTES = 8 * 1024 * 1024    # double-buffered out-tile budget (fits v5e)


def _round_up(x: int, m: int) -> int:
    return ((x + m - 1) // m) * m


def _vmem_capacity_bytes() -> int:
    try:
        return int(pltpu.get_tpu_info().vmem_capacity_bytes)
    except Exception:
        return 64 * 1024 * 1024      # conservative (v7x per-core VMEM)


def _is_v5e() -> bool:
    try:
        kind = jax.devices()[0].device_kind.lower()
    except Exception:
        return False
    return ("v5 lite" in kind) or ("v5e" in kind) or ("v5litepod" in kind)


def _onehot_gather_kernel(idx_ref, w_ref, out_ref):
    # idx_ref : (T, 1) int32 token ids for this block (VMEM).
    # w_ref   : (V, D) full embedding table, VMEM-resident (constant block idx).
    # out_ref : (T, D) output tile (lane-dense, full-tile writeback).
    tokens = idx_ref.shape[0]
    vocab = w_ref.shape[0]
    ids = idx_ref[...]                                                 # (T, 1)
    vocab_iota = lax.broadcasted_iota(jnp.int32, (tokens, vocab), 1)   # (T, V)
    w = w_ref[...]
    if w.dtype == jnp.bfloat16:
        # 0/1 one-hot is exact in bf16: single-pass bf16 MXU, f32 accumulate.
        one_hot = (ids == vocab_iota).astype(jnp.bfloat16)
        out = jnp.dot(one_hot, w, preferred_element_type=jnp.float32)
    else:
        # f32 (and f16 -> f32) tables: HIGHEST keeps the gather bit-exact.
        one_hot = (ids == vocab_iota).astype(jnp.float32)
        out = jnp.dot(one_hot, w.astype(jnp.float32),
                      preferred_element_type=jnp.float32,
                      precision=jax.lax.Precision.HIGHEST)
    out_ref[...] = out.astype(out_ref.dtype)
    # TODO(synk): replace the one-hot matmul with an in-VMEM sublane gather
    # (jnp.take on w_ref[...]) once the Mosaic lowering is verified everywhere.


def _make_hbm_gather_kernel(tokens: int, n_valid_total: int, n_ids: int):
    """HBM row-DMA gather kernel for one chunk of `n_ids` ids.

    tokens        : rows per output block (static).
    n_valid_total : number of non-padded tokens in this chunk (static).
    n_ids         : length of the scalar-prefetched id array (static).
    """
    depth = min(_DMA_DEPTH, tokens)
    pow2 = (depth & (depth - 1)) == 0

    def kernel(idx_ref, w_hbm, out_ref, sem):
        # idx_ref : scalar-prefetched flat token ids in SMEM.
        # w_hbm   : (V, D) embedding table left in HBM (memory_space=pl.ANY).
        # out_ref : (T, D) VMEM output tile; gathered rows are DMA'd into it.
        # sem     : (_DMA_DEPTH,) DMA semaphores -> `depth` rows kept in flight.
        base = pl.program_id(0) * tokens
        # Padded tokens (only in the last block) skip their DMAs entirely.
        valid = jnp.minimum(tokens, n_valid_total - base)

        def start(t, row, slot):
            pltpu.make_async_copy(
                w_hbm.at[pl.ds(row, 1), :],
                out_ref.at[pl.ds(t, 1), :],
                sem.at[slot],
            ).start()

        # Prime the pipeline with `depth` outstanding row DMAs.
        for s in range(depth):
            row_s = idx_ref[base + s]

            @pl.when(s < valid)
            def _(s=s, row_s=row_s):
                start(s, row_s, s)

        def step(t, carry):
            slot = jnp.bitwise_and(t, depth - 1) if pow2 else lax.rem(t, depth)
            nxt = t + depth
            # Hoist the SMEM id read above the wait: a DMA .wait() breaks SMEM
            # sst->sld forwarding, stalling every later scalar load.
            nxt_row = idx_ref[jnp.minimum(base + nxt, n_ids - 1)]

            @pl.when(t < valid)
            def _():
                # Dummy (1, D) descriptor only decrements the semaphore; valid
                # because every in-flight DMA is exactly one (1, D) row.
                pltpu.make_async_copy(
                    w_hbm.at[pl.ds(0, 1), :],
                    out_ref.at[pl.ds(0, 1), :],
                    sem.at[slot],
                ).wait()

            @pl.when(nxt < valid)
            def _():
                start(nxt, nxt_row, slot)

            return carry

        # Unroll by the DMA depth so the LLO scheduler overlaps descriptor
        # issue across iterations (tokens is a multiple of depth).
        lax.fori_loop(0, tokens, step, 0, unroll=depth)
        # TODO(synk): dedup/coalesce repeated ids within a block (VMEM->VMEM
        # copy for duplicates, multi-row DMA for contiguous id runs).

    return kernel


def wrapped_embedding_forward(indices: jax.Array, weight: jax.Array,
                              out_dtype=None, *, block_tokens: int | None = None,
                              force_hbm_gather: bool = False) -> jax.Array:
    """Pallas equivalent of WrappedEmbedding.forward (out_dtype ignored)."""
    del out_dtype  # unused in the PyTorch reference as well
    V, D = weight.shape
    lead_shape = indices.shape
    N = 1
    for s in lead_shape:
        N *= int(s)
    if N == 0:
        return jnp.zeros((*lead_shape, D), dtype=weight.dtype)

    flat_idx = indices.reshape(N).astype(jnp.int32)

    vmem_cap = _vmem_capacity_bytes()
    v5e = _is_v5e()
    if block_tokens is None:
        block_tokens = 128 if v5e else 256
    small_vocab_rows = 1024 if v5e else 4096
    itemsize = jnp.dtype(weight.dtype).itemsize

    # Token tile: multiple of 8 sublanes, >= 2 blocks when possible (feeds both
    # v7x TensorCores), capped so the double-buffered out tile fits scoped VMEM.
    t_cap_by_d = max(8, ((_OUT_TILE_BYTES // max(1, 2 * D * itemsize)) // 8) * 8)
    T = min(int(block_tokens), _round_up(pl.cdiv(N, 2), 8), t_cap_by_d)
    T = max(T, 8)
    num_blocks = pl.cdiv(N, T)
    n_pad = num_blocks * T
    if n_pad != N:
        # Pad with id 0 (always in range); padded rows are sliced off below.
        flat_idx = jnp.concatenate(
            [flat_idx, jnp.zeros((n_pad - N,), jnp.int32)])

    # Resident-table path only when the (double-buffered) table plus tiles fit
    # comfortably in this generation's VMEM.
    d_pad = _round_up(D, 128)
    table_bytes = V * d_pad * itemsize
    use_resident = (not force_hbm_gather
                    and V <= small_vocab_rows
                    and 2 * table_bytes <= vmem_cap // 4)

    if use_resident:
        # Small vocab: table resident in VMEM, gather = one_hot @ W on the MXU.
        w = weight if d_pad == D else jnp.pad(weight, ((0, 0), (0, d_pad - D)))
        idx_col = flat_idx.reshape(n_pad, 1)
        vmem_limit = min(
            int(vmem_cap * 0.85),
            max(32 << 20,
                2 * table_bytes + 2 * T * d_pad * itemsize + 8 * T * V + (8 << 20)))
        out = pl.pallas_call(
            _onehot_gather_kernel,
            out_shape=jax.ShapeDtypeStruct((n_pad, d_pad), weight.dtype),
            grid=(num_blocks,),
            in_specs=[
                pl.BlockSpec((T, 1), lambda i: (i, 0)),      # token ids per block
                # Constant block index -> the pipeline fetches the table once.
                # TODO(synk): single-buffer it via pipeline_mode=pl.Buffered(1)
                # once verified on all target generations.
                pl.BlockSpec((V, d_pad), lambda i: (0, 0)),
            ],
            out_specs=pl.BlockSpec((T, d_pad), lambda i: (i, 0)),
            compiler_params=pltpu.CompilerParams(
                dimension_semantics=("parallel",),
                vmem_limit_bytes=vmem_limit,
            ),
        )(idx_col, w)
        out = out[:N, :D]
    else:
        # Large vocab: table stays in HBM; pipelined per-row DMA gather.  The
        # call is chunked so the scalar-prefetched id array stays small in SMEM.
        chunk = max(T, (_MAX_PREFETCH_TOKENS // T) * T)
        pieces = []
        for start in range(0, n_pad, chunk):
            stop = min(start + chunk, n_pad)
            ids_chunk = flat_idx[start:stop]
            blocks = (stop - start) // T
            n_valid = min(N - start, stop - start)
            kernel = _make_hbm_gather_kernel(T, n_valid, stop - start)
            pieces.append(pl.pallas_call(
                kernel,
                out_shape=jax.ShapeDtypeStruct((stop - start, D), weight.dtype),
                grid_spec=pltpu.PrefetchScalarGridSpec(
                    num_scalar_prefetch=1,                        # ids -> SMEM
                    grid=(blocks,),
                    in_specs=[pl.BlockSpec(memory_space=pl.ANY)],  # table in HBM
                    out_specs=pl.BlockSpec((T, D), lambda i, idx: (i, 0)),
                    scratch_shapes=[pltpu.SemaphoreType.DMA((_DMA_DEPTH,))],
                ),
                compiler_params=pltpu.CompilerParams(
                    dimension_semantics=("parallel",),
                ),
            )(ids_chunk, weight))
        out = pieces[0] if len(pieces) == 1 else jnp.concatenate(pieces, axis=0)
        out = out[:N]

    return out.reshape(*lead_shape, D)


if __name__ == "__main__":
    key = jax.random.PRNGKey(0)
    k_w, k_i, k_w2, k_i2 = jax.random.split(key, 4)

    # Path 1: small vocab -> VMEM-resident table + one-hot MXU gather.
    VOCAB, DIM, B, S = 64, 128, 2, 8
    weight = jax.random.normal(k_w, (VOCAB, DIM), dtype=jnp.float32)
    indices = jax.random.randint(k_i, (B, S), minval=0, maxval=VOCAB,
                                 dtype=jnp.int32)
    out = jax.block_until_ready(wrapped_embedding_forward(indices, weight))
    ref = weight[indices]
    assert out.shape == (B, S, DIM)
    assert out.dtype == weight.dtype
    assert jnp.allclose(out, ref), "resident-table path mismatch vs reference"

    # Path 2: HBM table + pipelined row-DMA gather into the output tile.
    VOCAB2, DIM2, B2, S2 = 512, 256, 2, 24
    weight2 = jax.random.normal(k_w2, (VOCAB2, DIM2), dtype=jnp.float32)
    indices2 = jax.random.randint(k_i2, (B2, S2), minval=0, maxval=VOCAB2,
                                  dtype=jnp.int32)
    out2 = jax.block_until_ready(
        wrapped_embedding_forward(indices2, weight2, force_hbm_gather=True))
    ref2 = weight2[indices2]
    assert out2.shape == (B2, S2, DIM2)
    assert out2.dtype == weight2.dtype
    assert jnp.allclose(out2, ref2), "HBM-gather path mismatch vs reference"

    print("KERNEL_OK")
</pallas_src>

<mosaic_0001>
module attributes {stable_mosaic.version = 11 : i64} {
  func.func @_onehot_gather_kernel(%arg0: i32, %arg1: memref<8x1xi32, #tpu.memory_space<vmem>>, %arg2: memref<64x128xf32, #tpu.memory_space<vmem>>, %arg3: memref<8x128xf32, #tpu.memory_space<vmem>>) attributes {dimension_semantics = [#tpu.dimension_semantics<parallel>], iteration_bounds = array<i64: 2>, scalar_prefetch = 0 : i64, scratch_operands = 0 : i64, tpu.core_type = #tpu.core_type<tc>, window_params = [{transform_indices = @transform_0, window_bounds = array<i64: 8, 1>}, {pipeline_mode = #tpu.pipeline_mode<synchronous>, transform_indices = @transform_1, window_bounds = array<i64: 64, 128>}, {transform_indices = @transform_2, window_bounds = array<i64: 8, 128>}]} {
    %c0 = arith.constant 0 : index
    %c0_0 = arith.constant 0 : index
    %0 = vector.load %arg1[%c0, %c0_0] : memref<8x1xi32, #tpu.memory_space<vmem>>, vector<8x1xi32>
    %1 = tpu.iota {dimensions = array<i32: 1>} : vector<8x64xi32>
    %c0_1 = arith.constant 0 : index
    %c0_2 = arith.constant 0 : index
    %2 = vector.load %arg2[%c0_1, %c0_2] : memref<64x128xf32, #tpu.memory_space<vmem>>, vector<64x128xf32>
    %3 = vector.broadcast %0 : vector<8x1xi32> to vector<8x64xi32>
    %4 = arith.cmpi eq, %3, %1 : vector<8x64xi32>
    %5 = arith.extui %4 : vector<8x64xi1> to vector<8x64xi32>
    %6 = arith.sitofp %5 : vector<8x64xi32> to vector<8x64xf32>
    %cst = arith.constant dense<0.000000e+00> : vector<8x128xf32>
    %7 = tpu.matmul %6, %2, %cst {dimension_numbers = #tpu.dot_dimension_numbers<[1], [0], [0], [1], [0, 0, 1, 1], [], []>, precision = #tpu.contract_precision<fp32>} : vector<8x64xf32>, vector<64x128xf32>, vector<8x128xf32> -> vector<8x128xf32>
    %c0_3 = arith.constant 0 : index
    %c0_4 = arith.constant 0 : index
    %8 = vector.load %arg3[%c0_3, %c0_4] : memref<8x128xf32, #tpu.memory_space<vmem>>, vector<8x128xf32>
    tpu.vector_store %arg3[%c0_3, %c0_4], %7 {strides = array<i32>} : memref<8x128xf32, #tpu.memory_space<vmem>>, vector<8x128xf32>,
    return
  }
  func.func @transform_0(%arg0: i32) -> (i32, i32) {
    %c0_i32 = arith.constant 0 : i32
    %c0_i32_0 = arith.constant 0 : i32
    return %arg0, %c0_i32 : i32, i32
  }
  func.func @transform_1(%arg0: i32) -> (i32, i32) {
    %c0_i32 = arith.constant 0 : i32
    %c0_i32_0 = arith.constant 0 : i32
    %c0_i32_1 = arith.constant 0 : i32
    return %c0_i32, %c0_i32_0 : i32, i32
  }
  func.func @transform_2(%arg0: i32) -> (i32, i32) {
    %c0_i32 = arith.constant 0 : i32
    %c0_i32_0 = arith.constant 0 : i32
    return %arg0, %c0_i32 : i32, i32
  }
}

</mosaic_0001>

<bundles_post_ra>
// kernel: tpu_custom_call.1
= control target key start
LH: loop header
LB: loop body
LE: loop exit
PB: predicated region body
PF: predicated region fallthrough
CT: control target
= control target key end

     0   :  { %7 = vsyncpa [#allocation3], 0  ;;  %s1448_s0 = inlined_call_operand.vmem [shape: s32[16,1], index: 0, kind: input, shape index: {}]   ;;  %s1449_s1 = inlined_call_operand.hbm [shape: f32[64,128], index: 1, kind: input, shape index: {}]   ;;  %s1450_s2 = inlined_call_operand.hbm [shape: f32[16,128], index: 2, kind: output, shape index: {}]  }
   0x1   :  { %8 = vsyncpa [#allocation4], 0 }
   0x2   :  { %10 = vsyncpa [#allocation4 + $0x1], 0  ;;  %s1152_s9 = smov 0   ;;  %s1154_s10 = smov 0  }
   0x3   :  { %s1156_s11 = smov 0   ;;  %s1158_s12 = smov 0  }
   0x4 LB: > { %s1173_s13 = sadd.s32 4294967295, %s1128_s12   ;;  %s798_s14 = sadd.s32 4294967294, %s1128_s12   ;;  %s1128_s12 = sphi %s1158_s12, %s1458_s12   ;;  %s1124_s11 = sphi %s1156_s11, %s1457_s11   ;;  %s1120_s10 = sphi %s1154_s10, %s1456_s10   ;;  %s1116_s9 = sphi %s1152_s9, %s1455_s9  }
   0x5   : > { %s1177_s15 = sadd.s32 1, %s1128_s12   ;;  %s70_s16 = sadd.s32 1, %s1124_s11 }
   0x6   : > { %s67_s17 = ssub.s32 %s1128_s12, %s1177_s15  ;;  %p80_p0 = scmp.ne.s32.totalorder %s1124_s11, %s1120_s10 }
   0x7   : > { %p68_p1 = scmp.eq.s32.totalorder %s67_s17, 0  ;;  %p81_p2 = scmp.eq.s32.totalorder %s1173_s13, 1 }
   0x8   : > { %p86_p3 = scmp.ne.s32.totalorder %s1120_s10, %s1116_s9  ;;  %p87_p4 = scmp.eq.s32.totalorder %s798_s14, 1 }
   0x9   : > { %s1188_s18 = scalar_select %p68_p1, %s1124_s11, %s70_s16  }
   0xa   : > { %p1190_p5 = por %p81_p2, %p80_p0  ;;  %p1194_p6 = por %p87_p4, %p86_p3 }
   0xb   : > { %p799_p7 = scmp.ge.s32.totalorder %s1128_s12, 1  ;;  %p94_p8 = scmp.lt.s32.totalorder %s1128_s12, 3 }
   0xc   : > { %s1452_s20 = scalar_select %p1194_p6, 1, 0 }
   0xd   : > { %p996_p9 = scmp.eq.s32.totalorder %s1173_s13, 0  ;;  %p1201_p10 = pnand %p799_p7, %p94_p8 }
   0xe   : > { %s1130_s22 = smov [#allocation2]  }
   0xf   : > { %s106_s23 = sshll.u32 %s1130_s22, 4  ;;  %p988_p11 = pneg %p1201_p10  ;;  %s107_s23 = int_to_ptr.vmem [resolvable:$true] %s106_s23 }
  0x10   : > { %s1049_s24 = scalar_lea.vmem %s107_s23, 1024  ;;  %p1057_p3 = scmp.lt.s32.totalorder %s107_s23, %s107_s23 }
  0x11   : > { %p989_p12 = pnand %p996_p9, %p988_p11  ;;  %p1050_p0 = scmp.ne.s32.totalorder %s107_s23, %s1049_s24 }
  0x12   : > { %p1058_p4 = scmp.lt.s32.totalorder %s1049_s24, %s1049_s24 }
  0x13   : > { %p1040_p13 = pneg %p989_p12 }
  0x14   : > { %p1059_p6 = por %p1058_p4, %p1057_p3 }
  0x15   : > { %p1052_p1 = pnand %p1050_p0, %p1040_p13 }
  0x17   : > { %p1053_p2 = pneg %p1052_p1 }
  0x19   : > { %p1060_p7 = pnand %p1059_p6, %p1053_p2 }
  0x1b   : > { %1063 = shalt.err (!%p1060_p7)
}
  0x1c   : > { %s1131_s25 = smov 128   ;;  %s1132_s26 = smov 8  }
  0x1d   : > { %991 = dma.hbm_to_vmem [thread:$0]  (!%p989_p12), %s1449_s1, 1024, %s107_s23, [#allocation3], %s1131_s25, %s1131_s25, %s1132_s26  }
  0x1e   : > { %129 = sbr.rel (%p1201_p10) target bundleno = 422 (0x1a6), region = 28 }
  0x23   : > { %1107 = dma.done.wait (%p996_p9), [#allocation3], 1024  }
  0x24   : > { %1109 = vsyncadd (%p996_p9), [#allocation3], 4294966272  ;;  %p150_p8 = scmp.lt.s32.totalorder %s1173_s13, 1  ;;  %v1133_v0 = vmov 0   ;;  %v1134_v1 = vmov 0.0   ;;  %vm1135_vm0 = vmmov 0   ;;  %v155_v51 = vlaneseq }
  0x25   : > { %1037 = vset.pattern.permute.xlu0 %v1133_v0  ;;  %887 = vmatprep.subr.mxu1 %v1134_v1  ;;  %v164_v3 = vld [vmem:[#allocation2 + $0x38] sm:$0xff]  ;;  %v163_v4 = vld [vmem:[#allocation2 + $0x30] sm:$0xff]  ;;  %v162_v7 = vld [vmem:[#allocation2 + $0x28] sm:$0xff]  ;;  %vm171_vm1 = vcmask 523264   ;;  %s147_s6 = sand.u32 1, %s1120_s10   ;;  %s811_s8 = sshll.u32 %s1173_s13, 7 }
  0x26   : > { %s151_s29 = scalar_select %p150_p8, %s1173_s13, 1  ;;  %868 = vmatprep.subr.mxu0 %v1134_v1  ;;  %903 = vmatprep.mubr.msk.f32.mxu1 %vm1135_vm0, %v1134_v1  ;;  %v1229_v5 = vand.u32 4294901760, %v164_v3  ;;  %v1231_v6 = vand.u32 4294901760, %v163_v4  ;;  %v161_v8 = vld [vmem:[#allocation2 + $0x20] sm:$0xff]  ;;  %v160_v9 = vld [vmem:[#allocation2 + $0x18] sm:$0xff]  ;;  %v1233_v10 = vand.u32 4294901760, %v162_v7 }
  0x27   : > { %884 = vmatprep.mubr.msk.f32.mxu0 %vm1135_vm0, %v1134_v1  ;;  %v1235_v11 = vand.u32 4294901760, %v161_v8  ;;  %v1237_v12 = vand.u32 4294901760, %v160_v9  ;;  %v159_v13 = vld [vmem:[#allocation2 + $0x10] sm:$0xff]  ;;  %v158_v14 = vld [vmem:[#allocation2 + $0x8] sm:$0xff]  ;;  %v157_v15 = vld [vmem:[#allocation2] sm:$0xff]  ;;  %v156_v52 = vand.u32 127, %v155_v51  ;;  %s725_s22 = scalar_lea.hbm %s1450_s2, %s811_s8 }
  0x28   : > { %s805_s30 = sshll.u32 %s151_s29, 3  ;;  %v1240_v16 = vsub.f32 %v164_v3, %v1229_v5  ;;  %v1243_v17 = vsub.f32 %v163_v4, %v1231_v6  ;;  %869 = vmatpush3.msra.mxu0 %v1229_v5  ;;  %v1246_v18 = vand.u32 4294901760, %v159_v13  ;;  %v1248_v19 = vand.u32 4294901760, %v158_v14  ;;  %s804_s7 = sshll.u32 %s147_s6, 3 }
  0x29   : > { %s153_s5 = scalar_lea.vmem %s1448_s0, %s805_s30  ;;  %v1251_v20 = vsub.f32 %v162_v7, %v1233_v10  ;;  %v1254_v21 = vsub.f32 %v161_v8, %v1235_v11  ;;  %v1257_v22 = vsub.f32 %v160_v9, %v1237_v12  ;;  %870 = vmatprep.subr.mxu0 %v1134_v1  ;;  %v1260_v23 = vand.u32 4294901760, %v157_v15  ;;  %s149_s14 = scalar_lea.vmem [#allocation5], %s804_s7 }
  0x2a   : > { %v154_v2 = vld [vmem:[%s153_s5] sm:$0xff]  ;;  %v277_v24 = vand.u32 4294901760, %v1240_v16  ;;  %v284_v25 = vand.u32 4294901760, %v1243_v17  ;;  %v1265_v26 = vsub.f32 %v159_v13, %v1246_v18  ;;  %871 = vmatpush3.msra.mxu0 %v1231_v6  ;;  %v1279_v32 = vsub.f32 %v158_v14, %v1248_v19  ;;  %s727_s16 = sshll.u32 %s149_s14, 4  ;;  %s714_s23 = scalar_lea.sflag [#allocation4], %s147_s6  ;;  %s728_s16 = int_to_ptr.vmem [resolvable:$true] %s727_s16 }
  0x2b   : > { %166 = vperm.xlu0 %1037, %v154_v2   ;;  %v291_v27 = vand.u32 4294901760, %v1251_v20  ;;  %v298_v28 = vand.u32 4294901760, %v1254_v21  ;;  %872 = vmatprep.subr.mxu0 %v1134_v1  ;;  %v305_v31 = vand.u32 4294901760, %v1257_v22  ;;  %v1287_v34 = vsub.f32 %v157_v15, %v1260_v23  ;;  %s1064_s24 = scalar_lea.vmem %s728_s16, 128  ;;  %s1136_s25 = smov [#allocation5]  }
  0x2c   : > { %v278_v29 = vsub.f32 %v1240_v16, %v277_v24  ;;  %v285_v30 = vsub.f32 %v1243_v17, %v284_v25  ;;  %873 = vmatpush3.msra.mxu0 %v1233_v10  ;;  %v312_v38 = vand.u32 4294901760, %v1265_v26  ;;  %v319_v41 = vand.u32 4294901760, %v1279_v32  ;;  %p1065_p6 = scmp.ne.s32.totalorder %s728_s16, %s1064_s24  ;;  %s1068_s26 = sshll.u32 %s1136_s25, 4  ;;  %s1069_s26 = int_to_ptr.vmem [resolvable:$false] %s1068_s26 }
  0x2d   : > { %v292_v33 = vsub.f32 %v1251_v20, %v291_v27  ;;  %874 = vmatprep.subr.mxu0 %v1134_v1  ;;  %v299_v37 = vsub.f32 %v1254_v21, %v298_v28  ;;  %v306_v40 = vsub.f32 %v1257_v22, %v305_v31  ;;  %v326_v44 = vand.u32 4294901760, %v1287_v34  ;;  %s1070_s13 = scalar_lea.vmem %s1069_s26, 256  ;;  %p1071_p11 = scmp.lt.s32.totalorder %s728_s16, %s1069_s26 }
  0x2e   : > { %v279_v35 = vand.u32 4294901760, %v278_v29  ;;  %v286_v36 = vand.u32 4294901760, %v285_v30  ;;  %875 = vmatpush3.msra.mxu0 %v1235_v11  ;;  %v313_v43 = vsub.f32 %v1265_v26, %v312_v38  ;;  %v320_v46 = vsub.f32 %v1279_v32, %v319_v41  ;;  %p1066_p9 = pnand %p1065_p6, %p1190_p5  ;;  %p1072_p12 = scmp.lt.s32.totalorder %s1070_s13, %s1064_s24 }
  0x2f   : > { %876 = vmatprep.subr.mxu0 %v1134_v1  ;;  %v293_v39 = vand.u32 4294901760, %v292_v33  ;;  %v300_v42 = vand.u32 4294901760, %v299_v37  ;;  %v307_v45 = vand.u32 4294901760, %v306_v40  ;;  %v327_v48 = vsub.f32 %v1287_v34, %v326_v44 }
  0x30   : > { %888 = vmatpush3.msra.mxu1 %v279_v35  ;;  %877 = vmatpush3.msra.mxu0 %v1237_v12  ;;  %v314_v47 = vand.u32 4294901760, %v313_v43  ;;  %v321_v49 = vand.u32 4294901760, %v320_v46  ;;  %p1067_p10 = pneg %p1066_p9  ;;  %p1073_p13 = por %p1072_p12, %p1071_p11 }
  0x31   : > { %889 = vmatprep.subr.mxu1 %v1134_v1  ;;  %878 = vmatprep.subr.mxu0 %v1134_v1  ;;  %v328_v50 = vand.u32 4294901760, %v327_v48 }
  0x32   : > { %890 = vmatpush3.msra.mxu1 %v286_v36  ;;  %879 = vmatpush3.msra.mxu0 %v1246_v18  ;;  %p1074_p0 = pnand %p1073_p13, %p1067_p10 }
  0x33   : > { %891 = vmatprep.subr.mxu1 %v1134_v1  ;;  %880 = vmatprep.subr.mxu0 %v1134_v1 }
  0x34   : > { %892 = vmatpush3.msra.mxu1 %v293_v39  ;;  %881 = vmatpush3.msra.mxu0 %v1248_v19 }
  0x35   : > { %893 = vmatprep.subr.mxu1 %v1134_v1  ;;  %882 = vmatprep.subr.mxu0 %v1134_v1 }
  0x36   : > { %894 = vmatpush3.msra.mxu1 %v300_v42  ;;  %883 = vmatpush3.msra.mxu0 %v1260_v23 }
  0x37   : > { %895 = vmatprep.subr.mxu1 %v1134_v1  ;;  %906 = vmatprep.subr.mxu0 %v1134_v1 }
  0x38   : > { %896 = vmatpush3.msra.mxu1 %v307_v45 }
  0x39   : > { %897 = vmatprep.subr.mxu1 %v1134_v1 }
  0x3a   : > { %898 = vmatpush3.msra.mxu1 %v314_v47 }
  0x3b   : > { %899 = vmatprep.subr.mxu1 %v1134_v1 }
  0x3c   : > { %900 = vmatpush3.msra.mxu1 %v321_v49 }
  0x3d   : > { %901 = vmatprep.subr.mxu1 %v1134_v1 }
  0x3e   : > { %902 = vmatpush3.msra.mxu1 %v328_v50 }
  0x3f   : > { %925 = vmatprep.subr.mxu1 %v1134_v1 }
  0xa6   : > { %v167_v53 = vpop.permute.xlu0 %166 }
  0xa7   : > { %vm168_vm2 = vcmp.eq.s32.totalorder %v167_v53, %v156_v52 }
  0xa8   : > { %v1326_v54 = vsel %vm168_vm2, 1.0, %v1134_v1 }
  0xa9   : > { %v173_v55 = vsel %vm171_vm1, %v1326_v54, 0  ;;  %904 = vmatmul.mubr.msk.f32.vlgmr.msra.gmra.mxu1 %vm171_vm1, %v1326_v54 }
  0xaa   : > { %v249_v56 = vsub.f32 %v173_v55, %v173_v55  ;;  %926 = vmatpush3.msra.mxu1 %v1229_v5  ;;  %941 = vmatprep.mubr.msk.f32.mxu1 %vm1135_vm0, %v1134_v1 }
  0xab   : > { %927 = vmatprep.subr.mxu1 %v1134_v1 }
  0xac   : > { %928 = vmatpush3.msra.mxu1 %v1231_v6  ;;  %v250_v57 = vand.u32 4294901760, %v249_v56 }
  0xad   : > { %929 = vmatprep.subr.mxu1 %v1134_v1 }
  0xae   : > { %930 = vmatpush3.msra.mxu1 %v1233_v10  ;;  %v251_v58 = vsub.f32 %v249_v56, %v250_v57 }
  0xaf   : > { %931 = vmatprep.subr.mxu1 %v1134_v1 }
  0xb0   : > { %932 = vmatpush3.msra.mxu1 %v1235_v11  ;;  %v252_v59 = vand.u32 4294901760, %v251_v58 }
  0xb1   : > { %933 = vmatprep.subr.mxu1 %v1134_v1 }
  0xb2   : > { %934 = vmatpush3.msra.mxu1 %v1237_v12  ;;  %885 = vmatmul.mubr.f32.vlgmr.msra.gmra.mxu0 %v252_v59 }
  0xb3   : > { %907 = vmatpush3.msra.mxu0 %v1240_v16  ;;  %935 = vmatprep.subr.mxu1 %v1134_v1 }
  0xb4   : > { %908 = vmatprep.subr.mxu0 %v1134_v1  ;;  %936 = vmatpush3.msra.mxu1 %v1246_v18 }
  0xb5   : > { %909 = vmatpush3.msra.mxu0 %v1243_v17  ;;  %937 = vmatprep.subr.mxu1 %v1134_v1 }
  0xb6   : > { %910 = vmatprep.subr.mxu0 %v1134_v1  ;;  %938 = vmatpush3.msra.mxu1 %v1248_v19 }
  0xb7   : > { %911 = vmatpush3.msra.mxu0 %v1251_v20  ;;  %939 = vmatprep.subr.mxu1 %v1134_v1 }
  0xb8   : > { %912 = vmatprep.subr.mxu0 %v1134_v1  ;;  %940 = vmatpush3.msra.mxu1 %v1260_v23 }
  0xb9   : > { %913 = vmatpush3.msra.mxu0 %v1254_v21  ;;  %942 = vmatmul.mubr.f32.vlgmr.msra.gmra.mxu1 %v250_v57 }
  0xba   : > { %963 = vmatprep.subr.mxu1 %v1134_v1  ;;  %914 = vmatprep.subr.mxu0 %v1134_v1 }
  0xbb   : > { %964 = vmatpush3.msra.mxu1 %v1229_v5  ;;  %915 = vmatpush3.msra.mxu0 %v1257_v22 }
  0xbc   : > { %965 = vmatprep.subr.mxu1 %v1134_v1  ;;  %916 = vmatprep.subr.mxu0 %v1134_v1 }
  0xbd   : > { %966 = vmatpush3.msra.mxu1 %v1231_v6  ;;  %917 = vmatpush3.msra.mxu0 %v1265_v26 }
  0xbe   : > { %967 = vmatprep.subr.mxu1 %v1134_v1  ;;  %918 = vmatprep.subr.mxu0 %v1134_v1 }
  0xbf   : > { %968 = vmatpush3.msra.mxu1 %v1233_v10  ;;  %919 = vmatpush3.msra.mxu0 %v1279_v32 }
  0xc0   : > { %969 = vmatprep.subr.mxu1 %v1134_v1  ;;  %920 = vmatprep.subr.mxu0 %v1134_v1 }
  0xc1   : > { %970 = vmatpush3.msra.mxu1 %v1235_v11  ;;  %921 = vmatpush3.msra.mxu0 %v1287_v34 }
  0xc2   : > { %922 = vmatprep.mubr.msk.f32.mxu0 %vm1135_vm0, %v1134_v1  ;;  %971 = vmatprep.subr.mxu1 %v1134_v1 }
  0xc3   : > { %923 = vmatmul.mubr.f32.vlgmr.msra.gmra.mxu0 %v249_v56  ;;  %944 = vmatprep.subr.mxu0 %v1134_v1 }
  0xc4   : > { %972 = vmatpush3.msra.mxu1 %v1237_v12  ;;  %945 = vmatpush3.msra.mxu0 %v277_v24 }
  0xc5   : > { %973 = vmatprep.subr.mxu1 %v1134_v1  ;;  %946 = vmatprep.subr.mxu0 %v1134_v1 }
  0xc6   : > { %974 = vmatpush3.msra.mxu1 %v1246_v18  ;;  %947 = vmatpush3.msra.mxu0 %v284_v25 }
  0xc7   : > { %975 = vmatprep.subr.mxu1 %v1134_v1  ;;  %948 = vmatprep.subr.mxu0 %v1134_v1 }
  0xc8   : > { %976 = vmatpush3.msra.mxu1 %v1248_v19  ;;  %949 = vmatpush3.msra.mxu0 %v291_v27 }
  0xc9   : > { %977 = vmatprep.subr.mxu1 %v1134_v1  ;;  %950 = vmatprep.subr.mxu0 %v1134_v1 }
  0xca   : > { %978 = vmatpush3.msra.mxu1 %v1260_v23  ;;  %979 = vmatprep.mubr.msk.f32.mxu1 %vm1135_vm0, %v1134_v1 }
  0xcb   : > { %951 = vmatpush3.msra.mxu0 %v298_v28  ;;  %980 = vmatmul.mubr.msk.f32.vlgmr.msra.gmra.mxu1 %vm171_vm1, %v1326_v54 }
  0xcc   : > { %952 = vmatprep.subr.mxu0 %v1134_v1  ;;  %960 = vmatprep.mubr.msk.f32.mxu0 %vm1135_vm0, %v1134_v1 }
  0xcd   : > { %953 = vmatpush3.msra.mxu0 %v305_v31 }
  0xce   : > { %954 = vmatprep.subr.mxu0 %v1134_v1 }
  0xcf   : > { %955 = vmatpush3.msra.mxu0 %v312_v38 }
  0xd0   : > { %956 = vmatprep.subr.mxu0 %v1134_v1 }
  0xd1   : > { %957 = vmatpush3.msra.mxu0 %v319_v41 }
  0xd2   : > { %958 = vmatprep.subr.mxu0 %v1134_v1 }
  0xd3   : > { %959 = vmatpush3.msra.mxu0 %v326_v44 }
  0xd4   : > { %961 = vmatmul.mubr.msk.f32.vlgmr.msra.gmra.mxu0 %vm171_vm1, %v1326_v54 }
 0x169   : > { %v365_v60 = vpop.f32.mrf.mxu1 }
 0x16b   : > { %v905_v61 = vpop.f32.mrf.mxu1 }
 0x172   : > { %v254_v62 = vpop.f32.mrf.mxu0 }
 0x173   : > { %v366_v6 = vadd.f32 %v365_v60, %v254_v62 }
 0x174   : > { %v886_v63 = vpop.f32.mrf.mxu0 }
 0x179   : > { %v534_v0 = vpop.f32.mrf.mxu1 }
 0x17b   : > { %v943_v2 = vpop.f32.mrf.mxu1 }
 0x183   : > { %v453_v3 = vpop.f32.mrf.mxu0 }
 0x184   : > { %v454_v1 = vadd.f32 %v453_v3, %v366_v6 }
 0x185   : > { %v924_v4 = vpop.f32.mrf.mxu0 }
 0x186   : > { %v535_v8 = vadd.f32 %v534_v0, %v454_v1 }
 0x18b   : > { %v708_v5 = vpop.f32.mrf.mxu1 }
 0x18d   : > { %v981_v7 = vpop.f32.mrf.mxu1 }
 0x194   : > { %v629_v9 = vpop.f32.mrf.mxu0 }
 0x195   : > { %v630_v10 = vadd.f32 %v629_v9, %v535_v8 }
 0x196   : > { %v962_v11 = vpop.f32.mrf.mxu0 }
 0x197   : > { %v709_v12 = vadd.f32 %v708_v5, %v630_v10 }
 0x199   : > { %712 = vst [vmem:[%s149_s14] sm:$0xff] %v709_v12 }
 0x19a   : > { %1077 = shalt.err (!%p1074_p0)
}
 0x19b   : > { %s1078_s27 = scalar_lea.hbm %s725_s22, 128  ;;  %s1082_s30 = scalar_lea.hbm %s1450_s2, 256 }
 0x19c   : > { %p1079_p1 = scmp.ne.s32.totalorder %s725_s22, %s1078_s27  ;;  %p1083_p4 = scmp.lt.s32.totalorder %s725_s22, %s1450_s2 }
 0x19d   : > { %p1084_p7 = scmp.lt.s32.totalorder %s1082_s30, %s1078_s27 }
 0x19e   : > { %p1080_p2 = pnand %p1079_p1, %p1190_p5 }
 0x19f   : > { %p1085_p8 = por %p1084_p7, %p1083_p4 }
 0x1a0   : > { %p1081_p3 = pneg %p1080_p2 }
 0x1a2   : > { %p1086_p6 = pnand %p1085_p8, %p1081_p3 }
 0x1a4   : > { %1089 = shalt.err (!%p1086_p6)
}
 0x1a5   : > { %986 = dma.vmem_to_hbm [thread:$0]  (%p1190_p5), %s728_s16, 128, %s725_s22, %s714_s23  }
 0x1a6 PF: > { %p998_p9 = scmp.ge.s32.totalorder %s1128_s12, 2  ;;  %s739_s5 = sand.u32 1, %s1116_s9  }
 0x1a7   : > { %p1454_p10 = scmp.ne.s32.totalorder %s1452_s20, 0  ;;  %s740_s6 = scalar_lea.sflag [#allocation4], %s739_s5 }
 0x1a9   : > { %p993_p11 = pnand %p998_p9, %p1454_p10 }
 0x1ab   : > { %p994_p12 = pneg %p993_p11 }
 0x1ad   : > { %1111 = dma.done.wait (%p994_p12), %s740_s6, 128  }
 0x1ae   : > { %1113 = vsyncadd (%p994_p12), %s740_s6, 4294967168  ;;  %p13_p13 = scmp.ge.s32.totalorder %s1177_s15, 4   ;;  %s1455_s9 = smov %s1120_s10 }
 0x1af   : > { %s1456_s10 = smov %s1124_s11  ;;  %s1457_s11 = smov %s1188_s18 }
 0x1b0   : > { %s1458_s12 = smov %s1177_s15  ;;  %15 = sbr.rel (!%p13_p13) target bundleno = 4 (0x4), region = 68 }
 0x1b5   :  { %745 = vsyncpa [#allocation3], 1 }
 0x1b6   :  { %747 = vsyncpa [#allocation3 + $0x1], 1 }
 0x1b7   :  { %748 = vsyncpa [#allocation4], 1 }
 0x1b8   :  { %750 = vsyncpa [#allocation4 + $0x1], 1 }

</bundles_post_ra>
